<compile_context>
chip_gen: v5e
topology: v5e:2x2
jax: 0.10.0
libtpu: 0.0.40
codegen_flags: <defaults>
</compile_context>

<pallas_src>
import functools

import jax
import jax.numpy as jnp
from jax.experimental import pallas as pl
from jax.experimental.pallas import tpu as pltpu


# ---------------------------------------------------------------------------
# Kernel: out = x + a * tanh(y)   (elementwise hot path, fully in-kernel)
# ---------------------------------------------------------------------------
def _activation_kernel(x_ref, y_ref, a_ref, out_ref):
    # bf16 inputs: keep the whole update in bf16 (native bf16 VPU + EUP on
    # v6e/v7x; halves vreg footprint, drops up/down casts). Otherwise f32.
    compute_dtype = jnp.bfloat16 if out_ref.dtype == jnp.bfloat16 else jnp.float32
    x = x_ref[...].astype(compute_dtype)          # (tb, td)
    y = y_ref[...].astype(compute_dtype)          # (tb, td)
    a = a_ref[...].astype(compute_dtype)          # (1, td) -> broadcasts over rows
    out_ref[...] = (x + a * jnp.tanh(y)).astype(out_ref.dtype)


# ---------------------------------------------------------------------------
# Tiling helpers
# ---------------------------------------------------------------------------
def _sublane_multiple(dtype) -> int:
    # Sub-32-bit dtypes pack along sublanes: f32 -> 8, bf16 -> 16, int8 -> 32.
    itemsize = jnp.dtype(dtype).itemsize
    return 8 * max(1, 4 // max(1, itemsize))


def _round_up(x: int, m: int) -> int:
    return ((x + m - 1) // m) * m


@functools.lru_cache(maxsize=None)
def _per_block_budget_bytes() -> int:
    # ~1-2 MiB per operand block already saturates the HBM roofline for an
    # elementwise stream (measured 85%+ at 512-1024-row f32 tiles). On v7x
    # (64 MiB VMEM per TensorCore) stay at the low end so double-buffered
    # blocks + compiler scratch fit comfortably with both TCs active.
    try:
        vmem = pltpu.get_tpu_info().vmem_capacity_bytes
    except Exception:
        vmem = 128 << 20
    return (1 << 20) if vmem <= (64 << 20) else (2 << 20)


# ---------------------------------------------------------------------------
# Wrapper: out = x + a * tanh(y)
# ---------------------------------------------------------------------------
def _apply_activation_update(x, y, a, *, force_pallas=False):
    """x, y: (B, D); a: (D,). Returns x + a * tanh(y) in x.dtype."""
    B, D = x.shape
    dtype = x.dtype
    itemsize = jnp.dtype(dtype).itemsize
    compute_dtype = jnp.bfloat16 if dtype == jnp.bfloat16 else jnp.float32
    a_c = a.astype(compute_dtype)

    # Tiny problems: pallas_call dispatch + pipeline prologue dominate; the
    # XLA-fused elementwise expression is faster on every generation.
    if not force_pallas and B * D * itemsize < (128 << 10):
        out = x.astype(compute_dtype) + a_c * jnp.tanh(y.astype(compute_dtype))
        return out.astype(dtype)

    sub = _sublane_multiple(dtype)
    budget = _per_block_budget_bytes()

    # Feature tile: only split D when a single sublane-high slab would blow
    # the per-block budget and D is 128-aligned (keeps stores full-width).
    if D % 128 == 0 and sub * D * itemsize > budget:
        td = max(128, ((budget // (sub * itemsize)) // 128) * 128)
        td = min(td, D)
    else:
        td = D
        # TODO(synk): for large D that is not a multiple of 128, a lane-dense
        # (B*D)-flattened layout would avoid masked partial stores.

    # Batch tile: largest sublane-aligned tile within the budget, capped so
    # the batch grid has ~4 steps (v7x megacore sharding + pipeline overlap).
    tb = max(sub, ((budget // max(td * itemsize, 1)) // sub) * sub)
    tb = min(tb, _round_up(pl.cdiv(B, 4), sub))
    tb = max(tb, sub)

    grid = (pl.cdiv(B, tb), pl.cdiv(D, td))   # ragged last blocks are masked
    a2 = a_c.reshape(1, D)                    # lane-major broadcast vector

    return pl.pallas_call(
        _activation_kernel,
        out_shape=jax.ShapeDtypeStruct((B, D), dtype),
        grid_spec=pltpu.PrefetchScalarGridSpec(
            num_scalar_prefetch=0,
            grid=grid,
            in_specs=[
                pl.BlockSpec((tb, td), lambda i, j: (i, j)),   # x
                pl.BlockSpec((tb, td), lambda i, j: (i, j)),   # y
                pl.BlockSpec((1, td), lambda i, j: (0, j)),    # a (row-broadcast)
            ],
            out_specs=pl.BlockSpec((tb, td), lambda i, j: (i, j)),
        ),
        compiler_params=pltpu.CompilerParams(
            dimension_semantics=("parallel", "parallel"),
        ),
    )(x, y, a2)


# ---------------------------------------------------------------------------
# Module-equivalent wrapper
# ---------------------------------------------------------------------------
class Activation:
    """JAX/Pallas port of sympnet.model.Activation (activation = tanh)."""
    # TODO(synk): the PyTorch module takes an arbitrary activation callable;
    # this port hard-codes tanh inside the kernel.

    def __init__(self, dim, kind="upper", key=None, force_pallas=False):
        self._dim = dim
        self._kind = kind
        self._force_pallas = force_pallas
        if key is None:
            key = jax.random.PRNGKey(0)
        # nn.init.normal_ -> standard normal, deterministic via PRNGKey
        self._a = jax.random.normal(key, (dim,), dtype=jnp.float32)

    def __call__(self, p, q):
        if self._kind == "lower":
            q_new = _apply_activation_update(
                q, p, self._a, force_pallas=self._force_pallas)
            return p, q_new
        p_new = _apply_activation_update(
            p, q, self._a, force_pallas=self._force_pallas)
        return p_new, q


# ---------------------------------------------------------------------------
# Demo / correctness check
# ---------------------------------------------------------------------------
if __name__ == "__main__":
    key = jax.random.PRNGKey(0)
    k_a, k_p, k_q = jax.random.split(key, 3)

    batch, dim = 16, 256
    p = jax.random.normal(k_p, (batch, dim), dtype=jnp.float32)
    q = jax.random.normal(k_q, (batch, dim), dtype=jnp.float32)

    mod_u = Activation(dim, kind="upper", key=k_a, force_pallas=True)
    mod_l = Activation(dim, kind="lower", key=k_a, force_pallas=True)

    ref_p = p + mod_u._a * jnp.tanh(q)
    ref_q = q + mod_l._a * jnp.tanh(p)

    # kind='upper'
    p_new, q_new = mod_u(p, q)
    jax.block_until_ready((p_new, q_new))
    assert jnp.allclose(p_new, ref_p, atol=1e-5, rtol=1e-5)
    assert jnp.array_equal(q_new, q)

    # kind='lower'
    p_new2, q_new2 = mod_l(p, q)
    jax.block_until_ready((p_new2, q_new2))
    assert jnp.allclose(q_new2, ref_q, atol=1e-5, rtol=1e-5)
    assert jnp.array_equal(p_new2, p)

    # Ragged batch + non-128 feature dim: masked boundary block, no padding.
    b2, d2 = 10, 96
    p2 = jax.random.normal(k_p, (b2, d2), dtype=jnp.float32)
    q2 = jax.random.normal(k_q, (b2, d2), dtype=jnp.float32)
    mod_s = Activation(d2, kind="upper", key=k_a, force_pallas=True)
    ref_p2 = p2 + mod_s._a * jnp.tanh(q2)
    p2_new, q2_new = mod_s(p2, q2)
    jax.block_until_ready((p2_new, q2_new))
    assert jnp.allclose(p2_new, ref_p2, atol=1e-5, rtol=1e-5)
    assert jnp.array_equal(q2_new, q2)

    # bf16 path (native bf16 math in-kernel); loose tolerance vs f32 reference.
    pb = p.astype(jnp.bfloat16)
    qb = q.astype(jnp.bfloat16)
    mod_b = Activation(dim, kind="upper", key=k_a, force_pallas=True)
    ref_pb = pb.astype(jnp.float32) + mod_b._a * jnp.tanh(qb.astype(jnp.float32))
    pb_new, qb_new = mod_b(pb, qb)
    jax.block_until_ready((pb_new, qb_new))
    assert jnp.allclose(pb_new.astype(jnp.float32), ref_pb, atol=5e-2, rtol=5e-2)
    assert jnp.array_equal(qb_new, qb)

    print("KERNEL_OK")
</pallas_src>

<mosaic_0001>
module attributes {stable_mosaic.version = 11 : i64} {
  func.func @_activation_kernel(%arg0: i32, %arg1: i32, %arg2: memref<8x256xf32, #tpu.memory_space<vmem>>, %arg3: memref<8x256xf32, #tpu.memory_space<vmem>>, %arg4: memref<1x256xf32, #tpu.memory_space<vmem>>, %arg5: memref<8x256xf32, #tpu.memory_space<vmem>>) attributes {dimension_semantics = [#tpu.dimension_semantics<parallel>, #tpu.dimension_semantics<parallel>], iteration_bounds = array<i64: 2, 1>, scalar_prefetch = 0 : i64, scratch_operands = 0 : i64, tpu.core_type = #tpu.core_type<tc>, window_params = [{transform_indices = @transform_0, window_bounds = array<i64: 8, 256>}, {transform_indices = @transform_1, window_bounds = array<i64: 8, 256>}, {transform_indices = @transform_2, window_bounds = array<i64: 1, 256>}, {transform_indices = @transform_3, window_bounds = array<i64: 8, 256>}]} {
    %c0 = arith.constant 0 : index
    %c0_0 = arith.constant 0 : index
    %0 = vector.load %arg2[%c0, %c0_0] : memref<8x256xf32, #tpu.memory_space<vmem>>, vector<8x256xf32>
    %c0_1 = arith.constant 0 : index
    %c0_2 = arith.constant 0 : index
    %1 = vector.load %arg3[%c0_1, %c0_2] : memref<8x256xf32, #tpu.memory_space<vmem>>, vector<8x256xf32>
    %c0_3 = arith.constant 0 : index
    %c0_4 = arith.constant 0 : index
    %2 = vector.load %arg4[%c0_3, %c0_4] : memref<1x256xf32, #tpu.memory_space<vmem>>, vector<1x256xf32>
    %3 = math.tanh %1 : vector<8x256xf32>
    %4 = vector.broadcast %2 : vector<1x256xf32> to vector<8x256xf32>
    %5 = arith.mulf %4, %3 : vector<8x256xf32>
    %6 = arith.addf %0, %5 : vector<8x256xf32>
    %c0_5 = arith.constant 0 : index
    %c0_6 = arith.constant 0 : index
    %7 = vector.load %arg5[%c0_5, %c0_6] : memref<8x256xf32, #tpu.memory_space<vmem>>, vector<8x256xf32>
    tpu.vector_store %arg5[%c0_5, %c0_6], %6 {strides = array<i32>} : memref<8x256xf32, #tpu.memory_space<vmem>>, vector<8x256xf32>,
    return
  }
  func.func @transform_0(%arg0: i32, %arg1: i32) -> (i32, i32) {
    %c0_i32 = arith.constant 0 : i32
    return %arg0, %arg1 : i32, i32
  }
  func.func @transform_1(%arg0: i32, %arg1: i32) -> (i32, i32) {
    %c0_i32 = arith.constant 0 : i32
    return %arg0, %arg1 : i32, i32
  }
  func.func @transform_2(%arg0: i32, %arg1: i32) -> (i32, i32) {
    %c0_i32 = arith.constant 0 : i32
    %c0_i32_0 = arith.constant 0 : i32
    return %c0_i32, %arg1 : i32, i32
  }
  func.func @transform_3(%arg0: i32, %arg1: i32) -> (i32, i32) {
    %c0_i32 = arith.constant 0 : i32
    return %arg0, %arg1 : i32, i32
  }
}

</mosaic_0001>

<bundles_post_ra>
// kernel: tpu_custom_call.1
= control target key start
LH: loop header
LB: loop body
LE: loop exit
PB: predicated region body
PF: predicated region fallthrough
CT: control target
= control target key end

     0   :  { %s897_s0 = inlined_call_operand.hbm [shape: f32[16,256], index: 0, kind: input, shape index: {}]   ;;  %s898_s1 = inlined_call_operand.hbm [shape: f32[16,256], index: 1, kind: input, shape index: {}]   ;;  %s899_s2 = inlined_call_operand.hbm [shape: f32[1,256], index: 2, kind: input, shape index: {}]   ;;  %s900_s3 = inlined_call_operand.hbm [shape: f32[16,256], index: 3, kind: output, shape index: {}]  }
   0x1   :  { %903 = sst [smem:[#allocation16_spill]] %s899_s2 }
   0x2   :  { %8 = vsyncpa [#allocation3], 0 }
   0x3   :  { %10 = vsyncpa [#allocation3 + $0x1], 0 }
   0x4   :  { %11 = vsyncpa [#allocation6], 0 }
   0x5   :  { %13 = vsyncpa [#allocation6 + $0x1], 0 }
   0x6   :  { %14 = vsyncpa [#allocation4], 0 }
   0x7   :  { %16 = vsyncpa [#allocation4 + $0x1], 0  ;;  %s743_s12 = smov 0   ;;  %s745_s13 = smov 0  }
   0x8   :  { %s747_s14 = smov 0   ;;  %s749_s15 = smov 0  }
   0x9   :  { %s751_s16 = smov 0   ;;  %s753_s17 = smov 0  }
   0xa LB: > { %904 = sst [smem:[#allocation13_spill]] %s716_s16  ;;  %s774_s18 = sadd.s32 4294967295, %s720_s17   ;;  %s720_s17 = sphi %s753_s17, %s22_s17   ;;  %s716_s16 = sphi %s751_s16, %s915_s16   ;;  %s712_s15 = sphi %s749_s15, %s914_s15   ;;  %s708_s14 = sphi %s747_s14, %s918_s14   ;;  %s704_s13 = sphi %s745_s13, %s917_s13   ;;  %s700_s12 = sphi %s743_s12, %s916_s12  }
   0xb   : > { %s435_s19 = sadd.s32 4294967294, %s720_s17   ;;  %p56_p0 = scmp.ne.s32.totalorder %s704_s13, %s700_s12 }
   0xc   : > { %p57_p1 = scmp.eq.s32.totalorder %s774_s18, 0  ;;  %p136_p2 = scmp.eq.s32.totalorder %s774_s18, 1 }
   0xd   : > { %p142_p3 = scmp.eq.s32.totalorder %s435_s19, 1  ;;  %p436_p5 = scmp.ge.s32.totalorder %s720_s17, 1 }
   0xe   : > { %p783_p4 = por %p57_p1, %p56_p0  ;;  %p149_p7 = scmp.lt.s32.totalorder %s720_s17, 3 }
   0xf   : > { %p788_p6 = por %p142_p3, %p56_p0  ;;  %s907_s2 = sld [smem:[#allocation16_spill]] }
  0x10   : > { %p796_p8 = pnand %p436_p5, %p149_p7  ;;  %p438_p9 = scmp.ge.s32.totalorder %s720_s17, 2 }
  0x11   : > { %s722_s26 = smov [#allocation7]   ;;  %s34_s28 = sadd.s32 1, %s716_s16 }
  0x12   : > { %p468_p10 = pneg %p796_p8  ;;  %s165_s27 = sshll.u32 %s722_s26, 4  ;;  %s166_s27 = int_to_ptr.vmem [resolvable:$true] %s165_s27 }
  0x13   : > { %p36_p12 = scmp.ge.s32.totalorder %s34_s28, 2  ;;  %s43_s29 = sadd.s32 1, %s708_s14 }
  0x14   : > { %p469_p11 = pnand %p468_p10, %p57_p1  ;;  %p50_p13 = scmp.ne.s32.totalorder %s708_s14, %s704_s13 }
  0x15   : > { %s163_s24 = sshll.u32 %s907_s2, 4  ;;  %p51_p0 = scmp.eq.s32.totalorder %s720_s17, 0  ;;  %s164_s24 = int_to_ptr.hbm [resolvable:$true] %s163_s24 }
  0x16   : > { %471 = dma.hbm_to_vmem [thread:$0]  (!%p469_p11), %s164_s24, 32, %s166_s27, [#allocation6]  }
  0x17   : > { %s920_s28 = smov (%p36_p12, %s34_s28), 0  ;;  %p812_p3 = por %p51_p0, %p50_p13 }
  0x18   : > { %909 = sst [smem:[#allocation14_spill]] %s920_s28  ;;  %p818_p5 = por %p136_p2, %p50_p13 }
  0x19   : > { %s38_s5 = ssub.s32 %s716_s16, %s920_s28  ;;  %p484_p7 = scmp.lt.s32.totalorder %s720_s17, 2 }
  0x1a   : > { %p41_p10 = scmp.eq.s32.totalorder %s38_s5, 0  ;;  %s176_s6 = sand.u32 1, %s708_s14  }
  0x1b   : > { %s439_s7 = sshll.u32 %s176_s6, 4  ;;  %s455_s9 = sshll.u32 %s716_s16, 4 }
  0x1c   : > { %s827_s8 = scalar_select %p41_p10, %s708_s14, %s43_s29  }
  0x1d   : > { %s187_s19 = scalar_lea.hbm %s897_s0, %s455_s9  ;;  %s180_s22 = scalar_lea.vmem [#allocation2], %s439_s7 }
  0x1e   : > { %912 = sst [smem:[#allocation15_spill]] %s827_s8  ;;  %s191_s23 = sshll.u32 %s180_s22, 4  ;;  %s192_s23 = int_to_ptr.vmem [resolvable:$true] %s191_s23 }
  0x1f   : > { %s189_s24 = sshll.u32 %s187_s19, 4  ;;  %p473_p2 = pnand %p484_p7, %p812_p3  ;;  %s190_s24 = int_to_ptr.hbm [resolvable:$true] %s189_s24 }
  0x20   : > { %s209_s5 = scalar_lea.hbm %s898_s1, %s455_s9  ;;  %s198_s2 = sand.u32 1, %s720_s17  }
  0x21   : > { %s177_s28 = scalar_lea.sflag [#allocation3], %s176_s6  ;;  %s211_s29 = sshll.u32 %s209_s5, 4  ;;  %s212_s29 = int_to_ptr.hbm [resolvable:$true] %s211_s29 }
  0x22   : > { %475 = dma.hbm_to_vmem [thread:$0]  (!%p473_p2), %s190_s24, 256, %s192_s23, %s177_s28  }
  0x23   : > { %s202_s16 = scalar_lea.vmem [#allocation5], %s439_s7  ;;  %s199_s10 = scalar_lea.sflag [#allocation6], %s198_s2 }
  0x24   : > { %s213_s8 = sshll.u32 %s202_s16, 4  ;;  %222 = sbr.rel (%p796_p8) target bundleno = 63 (0x3f), region = 32  ;;  %s214_s8 = int_to_ptr.vmem [resolvable:$true] %s213_s8 }
  0x25   : > { %478 = dma.hbm_to_vmem [thread:$0]  (!%p473_p2), %s212_s29, 256, %s214_s8, %s199_s10  }
  0x26   : > { %s842_s30 = sand.u32 (!%p796_p8), 1, %s704_s13  }
  0x27   : > { %s446_s9 = sshll.u32 (!%p796_p8), %s842_s30, 4  ;;  %s225_s11 = scalar_lea.sflag (!%p796_p8), [#allocation3], %s842_s30 }
  0x28   : > { %s228_s6 = scalar_lea.vmem (!%p796_p8), [#allocation2], %s446_s9 }
  0x29   : > { %683 = dma.done.wait (%p783_p4), %s225_s11, 256  }
  0x2a   : > { %685 = vsyncadd (%p783_p4), %s225_s11, 4294967040  ;;  %s234_s2 = sand.u32 1, %s774_s18   ;;  %s238_s25 = scalar_lea.vmem [#allocation5], %s446_s9 }
  0x2b   : > { %s235_s16 = scalar_lea.sflag [#allocation6], %s234_s2 }
  0x2c   : > { %687 = dma.done.wait (%p783_p4), %s235_s16, 256  }
  0x2d   : > { %689 = vsyncadd (%p783_p4), %s235_s16, 4294967040 }
  0x2e   : > { %691 = dma.done.wait (%p57_p1), [#allocation6], 32  }
  0x2f   : > { %693 = vsyncadd (%p57_p1), [#allocation6], 4294967264  ;;  %v278_v0 = vld [vmem:[%s238_s25] sm:$0xff]  ;;  %v279_v2 = vld [vmem:[%s238_s25 + $0x8] sm:$0xff]  ;;  %s457_s28 = sshll.u32 %s712_s15, 4  ;;  %s271_s18 = scalar_lea.vmem [#allocation8], %s446_s9 }
  0x30   : > { %v280_v1 = vld [vmem:[#allocation7] sm:$0x3]  ;;  %536 = vtanh.f32 %v278_v0  ;;  %s308_s20 = scalar_lea.hbm %s900_s3, %s457_s28  ;;  %s310_s19 = sshll.u32 %s271_s18, 4  ;;  %v277_v9 = vld [vmem:[%s228_s6 + $0x8] sm:$0xff]  ;;  %s311_s19 = int_to_ptr.vmem [resolvable:$true] %s310_s19 }
  0x31   : > { %538 = vtanh.f32 %v279_v2  ;;  %v284_v3 = vperm.slane %v280_v1, 0  ;;  %v285_v4 = vperm.slane %v280_v1, 1  ;;  %v276_v6 = vld [vmem:[%s228_s6] sm:$0xff]  ;;  %s312_s22 = sshll.u32 %s308_s20, 4  ;;  %s295_s15 = scalar_lea.sflag [#allocation4], %s842_s30  ;;  %s313_s22 = int_to_ptr.hbm [resolvable:$true] %s312_s22 }
  0x32   : > { %s644_s23 = sshra.s32 %s313_s22, 4  ;;  %s650_s5 = scalar_lea.hbm %s900_s3, 32  ;;  %s645_s23 = int_to_ptr.hbm [resolvable:$true] %s644_s23 }
  0x33   : > { %s646_s24 = scalar_lea.hbm %s645_s23, 16  ;;  %p651_p11 = scmp.lt.s32.totalorder %s645_s23, %s900_s3 }
  0x34   : > { %p647_p1 = scmp.ne.s32.totalorder %s645_s23, %s646_s24  ;;  %p652_p12 = scmp.lt.s32.totalorder %s650_s5, %s646_s24 }
  0x36   : > { %v537_v5 = vpop.eup %536  ;;  %p648_p4 = pnand %p647_p1, %p818_p5  ;;  %p653_p13 = por %p652_p12, %p651_p11 }
  0x37   : > { %v539_v7 = vpop.eup %538  ;;  %v288_v8 = vmul.f32 %v537_v5, %v284_v3 }
  0x38   : > { %v289_v10 = vmul.f32 %v539_v7, %v285_v4  ;;  %p649_p8 = pneg %p648_p4 }
  0x39   : > { %v290_v11 = vadd.f32 %v288_v8, %v276_v6 }
  0x3a   : > { %v291_v12 = vadd.f32 %v289_v10, %v277_v9  ;;  %p654_p0 = pnand %p653_p13, %p649_p8 }
  0x3b   : > { %292 = vst [vmem:[%s271_s18] sm:$0xff] %v290_v11 }
  0x3c   : > { %293 = vst [vmem:[%s271_s18 + $0x8] sm:$0xff] %v291_v12 }
  0x3d   : > { %657 = shalt.err (!%p654_p0)
}
  0x3e   : > { %466 = dma.vmem_to_hbm [thread:$0]  (%p818_p5), %s311_s19, 256, %s313_s22, %s295_s15  }
  0x3f PF: > { %s324_s30 = sand.u32 1, %s700_s12   ;;  %p480_p3 = pnand %p438_p9, %p788_p6 }
  0x40   : > { %s325_s9 = scalar_lea.sflag [#allocation4], %s324_s30 }
  0x41   : > { %p481_p7 = pneg %p480_p3 }
  0x43   : > { %695 = dma.done.wait (%p481_p7), %s325_s9, 256  }
  0x44   : > { %697 = vsyncadd (%p481_p7), %s325_s9, 4294967040  ;;  %s22_s17 = sadd.s32 1, %s720_s17   ;;  %s913_s11 = sld [smem:[#allocation15_spill]] }
  0x45   : > { %p19_p10 = scmp.ge.s32.totalorder %s22_s17, 4   ;;  %s914_s15 = sld [smem:[#allocation13_spill]] }
  0x46   : > { %s915_s16 = sld [smem:[#allocation14_spill]]  ;;  %s916_s12 = smov %s704_s13 }
  0x47   : > { %s917_s13 = smov %s708_s14  ;;  %21 = sbr.rel (!%p19_p10) target bundleno = 10 (0xa), region = 95 }
  0x4a   : > { %s918_s14 = smov %s913_s11 }
  0x4c   :  { %331 = vsyncpa [#allocation3], 1 }
  0x4d   :  { %333 = vsyncpa [#allocation3 + $0x1], 1 }
  0x4e   :  { %334 = vsyncpa [#allocation6], 1 }
  0x4f   :  { %336 = vsyncpa [#allocation6 + $0x1], 1 }
  0x50   :  { %337 = vsyncpa [#allocation4], 1 }
  0x51   :  { %339 = vsyncpa [#allocation4 + $0x1], 1 }

</bundles_post_ra>
